<compile_context>
chip_gen: v7x
topology: tpu7x:2x2x1
jax: 0.10.0
libtpu: 0.0.40
codegen_flags: <defaults>
</compile_context>

<pallas_src>
import math

import jax
import jax.numpy as jnp
from jax.experimental import pallas as pl
from jax.experimental.pallas import tpu as pltpu

# ---- model hyper-params (small, consistent with the module's forward) ----
BATCH = 2
SEQ = 8
HIDDEN = 32
NUM_HEADS = 4
MLP_DIM = 64
EPS = 1e-6
HEAD_DIM = HIDDEN // NUM_HEADS


def _layer_norm(v, w, b):
    mu = jnp.mean(v, axis=-1, keepdims=True)
    var = jnp.mean((v - mu) ** 2, axis=-1, keepdims=True)
    return (v - mu) * jax.lax.rsqrt(var + EPS) * w + b


def _erf(z):
    # Abramowitz & Stegun 7.1.26 (max abs error ~1.5e-7): only exp + VPU ops,
    # avoids relying on a lax.erf lowering inside the kernel.
    a1, a2, a3, a4, a5 = 0.254829592, -0.284496736, 1.421413741, -1.453152027, 1.061405429
    p = 0.3275911
    az = jnp.abs(z)
    t = 1.0 / (1.0 + p * az)
    poly = ((((a5 * t + a4) * t + a3) * t + a2) * t + a1) * t
    y = 1.0 - poly * jnp.exp(-az * az)
    return jnp.where(z < 0, -y, y)


def encoder_block_kernel(
    x_ref,                        # (B*S, D)
    ln1_w_ref, ln1_b_ref,         # (1, D)
    in_wt_ref, in_b_ref,          # (D, 3D) [pre-transposed, Q-rows pre-scaled], (1, 3D)
    out_wt_ref, out_b_ref,        # (D, D)  [pre-transposed], (1, D)
    ln2_w_ref, ln2_b_ref,         # (1, D)
    fc1_wt_ref, fc1_b_ref,        # (D, MLP) [pre-transposed], (1, MLP)
    fc2_wt_ref, fc2_b_ref,        # (MLP, D) [pre-transposed], (1, D)
    o_ref,                        # (B*S, D)
):
    B, S, D, H, HD = BATCH, SEQ, HIDDEN, NUM_HEADS, HEAD_DIM
    BS = B * S

    x = x_ref[...].astype(jnp.float32)                           # (BS, D)

    # ---------------- attention block ----------------
    ln1 = _layer_norm(x, ln1_w_ref[0], ln1_b_ref[0])

    # qkv = ln1 @ W_in^T + b_in ; W_in^T is passed pre-transposed (and its Q
    # block pre-scaled by 1/sqrt(HD)) -> plain dot, no score scaling needed.
    qkv = jnp.dot(ln1, in_wt_ref[...],
                  preferred_element_type=jnp.float32) + in_b_ref[0]   # (BS, 3D)

    out_wt = out_wt_ref[...]                                     # (D, D)
    attn = jnp.zeros((BS, D), jnp.float32)

    for h in range(H):                                           # unrolled, H=4
        lo = h * HD
        qh = qkv[:, lo:lo + HD].reshape(B, S, HD)
        kh = qkv[:, D + lo:D + lo + HD].reshape(B, S, HD)
        vh = qkv[:, 2 * D + lo:2 * D + lo + HD].reshape(B, S, HD)

        # batched over B; contraction handles the transpose -> no kh.T
        s = jnp.einsum("bqd,bkd->bqk", qh, kh,
                       preferred_element_type=jnp.float32)            # (B,S,S)
        s = s - jnp.max(s, axis=-1, keepdims=True)
        p = jnp.exp(s)
        p = p * pl.reciprocal(jnp.sum(p, axis=-1, keepdims=True), approx=True)
        oh = jnp.einsum("bqk,bkd->bqd", p, vh,
                        preferred_element_type=jnp.float32)           # (B,S,HD)

        # Fold head output straight into the output projection:
        #   concat_h(o_h) @ W_out^T == sum_h o_h @ W_out^T[h*HD:(h+1)*HD, :]
        attn = attn + jnp.dot(
            oh.reshape(BS, HD), out_wt[lo:lo + HD, :],
            preferred_element_type=jnp.float32)

    y1 = attn + out_b_ref[0] + x                                 # residual 1

    # ---------------- MLP block ----------------
    ln2 = _layer_norm(y1, ln2_w_ref[0], ln2_b_ref[0])
    h1 = jnp.dot(ln2, fc1_wt_ref[...],
                 preferred_element_type=jnp.float32) + fc1_b_ref[0]
    # exact GELU (nn.GELU default): 0.5*x*(1+erf(x/sqrt(2)))
    h1 = 0.5 * h1 * (1.0 + _erf(h1 * (1.0 / math.sqrt(2.0))))
    h2 = jnp.dot(h1, fc2_wt_ref[...],
                 preferred_element_type=jnp.float32) + fc2_b_ref[0]

    o_ref[...] = (h2 + y1).astype(o_ref.dtype)                   # residual 2


def encoder_block(x, params):
    B, S, D = x.shape
    p = params

    # Fold the 1/sqrt(head_dim) attention scale into the Q rows of the input
    # projection (weight prep, done once in the wrapper).
    scale = 1.0 / math.sqrt(HEAD_DIM)
    q_scale = jnp.concatenate(
        [jnp.full((D,), scale, p["in_w"].dtype),
         jnp.ones((2 * D,), p["in_w"].dtype)], axis=0)           # (3D,)
    in_w_scaled = p["in_w"] * q_scale[:, None]                   # (3D, D)
    in_b_scaled = p["in_b"] * q_scale                            # (1, 3D)

    # Pre-transpose weights so the kernel's MXU operands are (in, out) layout.
    weights = [
        p["ln1_w"], p["ln1_b"],
        in_w_scaled.T, in_b_scaled,
        p["out_w"].T, p["out_b"],
        p["ln2_w"], p["ln2_b"],
        p["fc1_w"].T, p["fc1_b"],
        p["fc2_w"].T, p["fc2_b"],
    ]

    def full_spec(a):
        return pl.BlockSpec(a.shape, lambda i: (0,) * a.ndim)

    flops = int(
        2 * B * S * (D * 3 * D + D * D + 2 * D * MLP_DIM)
        + 4 * B * NUM_HEADS * S * S * HEAD_DIM
    )
    transcendentals = int(B * NUM_HEADS * S * S + B * S * MLP_DIM + 2 * B * S)
    bytes_accessed = int(4 * (2 * B * S * D + sum(int(w.size) for w in weights)))

    x2 = x.reshape(B * S, D)                                     # lane-dense 2-D slab
    out2 = pl.pallas_call(
        encoder_block_kernel,
        out_shape=jax.ShapeDtypeStruct((B * S, D), x.dtype),
        grid=(1,),
        in_specs=[pl.BlockSpec((B * S, D), lambda i: (0, 0))]
        + [full_spec(w) for w in weights],
        out_specs=pl.BlockSpec((B * S, D), lambda i: (0, 0)),
        compiler_params=pltpu.CompilerParams(dimension_semantics=("arbitrary",)),
        cost_estimate=pl.CostEstimate(
            flops=flops,
            transcendentals=transcendentals,
            bytes_accessed=bytes_accessed,
        ),
    )(x2, *weights)
    return out2.reshape(B, S, D)


# ---------------- pure-JAX reference (for sanity check) ----------------
def encoder_block_ref(x, p):
    def ln(v, w, b):
        mu = jnp.mean(v, axis=-1, keepdims=True)
        var = jnp.mean((v - mu) ** 2, axis=-1, keepdims=True)
        return (v - mu) / jnp.sqrt(var + EPS) * w + b

    B, S, D = x.shape
    l1 = ln(x, p["ln1_w"][0], p["ln1_b"][0])
    qkv = l1 @ p["in_w"].T + p["in_b"][0]
    q, k, v = qkv[..., :D], qkv[..., D:2 * D], qkv[..., 2 * D:]

    def split(t):  # (B,S,D) -> (B,H,S,hd)
        return t.reshape(B, S, NUM_HEADS, HEAD_DIM).transpose(0, 2, 1, 3)

    qh, kh, vh = split(q), split(k), split(v)
    s = jnp.einsum("bhqd,bhkd->bhqk", qh, kh) / math.sqrt(HEAD_DIM)
    a = jax.nn.softmax(s, axis=-1)
    o = jnp.einsum("bhqk,bhkd->bhqd", a, vh).transpose(0, 2, 1, 3).reshape(B, S, D)
    attn_out = o @ p["out_w"].T + p["out_b"][0]
    y1 = attn_out + x

    l2 = ln(y1, p["ln2_w"][0], p["ln2_b"][0])
    h1 = l2 @ p["fc1_w"].T + p["fc1_b"][0]
    h1 = 0.5 * h1 * (1.0 + jax.lax.erf(h1 / jnp.sqrt(2.0)))
    h2 = h1 @ p["fc2_w"].T + p["fc2_b"][0]
    return h2 + y1


def init_params(key):
    ks = jax.random.split(key, 8)
    f32 = jnp.float32
    return {
        "ln1_w": jnp.ones((1, HIDDEN), f32),
        "ln1_b": jnp.zeros((1, HIDDEN), f32),
        "in_w": 0.02 * jax.random.normal(ks[0], (3 * HIDDEN, HIDDEN), f32),
        "in_b": 0.01 * jax.random.normal(ks[1], (1, 3 * HIDDEN), f32),
        "out_w": 0.02 * jax.random.normal(ks[2], (HIDDEN, HIDDEN), f32),
        "out_b": 0.01 * jax.random.normal(ks[3], (1, HIDDEN), f32),
        "ln2_w": jnp.ones((1, HIDDEN), f32),
        "ln2_b": jnp.zeros((1, HIDDEN), f32),
        "fc1_w": 0.02 * jax.random.normal(ks[4], (MLP_DIM, HIDDEN), f32),
        "fc1_b": 0.01 * jax.random.normal(ks[5], (1, MLP_DIM), f32),
        "fc2_w": 0.02 * jax.random.normal(ks[6], (HIDDEN, MLP_DIM), f32),
        "fc2_b": 0.01 * jax.random.normal(ks[7], (1, HIDDEN), f32),
    }


if __name__ == "__main__":
    key = jax.random.PRNGKey(0)
    kx, kp = jax.random.split(key)
    x = jax.random.normal(kx, (BATCH, SEQ, HIDDEN), jnp.float32)
    params = init_params(kp)

    out = jax.block_until_ready(encoder_block(x, params))

    ref = encoder_block_ref(x, params)
    assert out.shape == (BATCH, SEQ, HIDDEN)
    # tolerance slightly loosened: softmax denominator uses the EUP approximate
    # reciprocal and GELU uses a float32-accurate erf polynomial.
    max_err = jnp.max(jnp.abs(out - ref))
    assert jnp.allclose(out, ref, atol=2e-3, rtol=2e-3), f"max err {max_err}"
    print("KERNEL_OK")
</pallas_src>

<mosaic_0001>
module attributes {stable_mosaic.version = 11 : i64} {
  func.func @encoder_block_kernel(%arg0: i32, %arg1: memref<16x32xf32, #tpu.memory_space<vmem>>, %arg2: memref<1x32xf32, #tpu.memory_space<vmem>>, %arg3: memref<1x32xf32, #tpu.memory_space<vmem>>, %arg4: memref<32x96xf32, #tpu.memory_space<vmem>>, %arg5: memref<1x96xf32, #tpu.memory_space<vmem>>, %arg6: memref<32x32xf32, #tpu.memory_space<vmem>>, %arg7: memref<1x32xf32, #tpu.memory_space<vmem>>, %arg8: memref<1x32xf32, #tpu.memory_space<vmem>>, %arg9: memref<1x32xf32, #tpu.memory_space<vmem>>, %arg10: memref<32x64xf32, #tpu.memory_space<vmem>>, %arg11: memref<1x64xf32, #tpu.memory_space<vmem>>, %arg12: memref<64x32xf32, #tpu.memory_space<vmem>>, %arg13: memref<1x32xf32, #tpu.memory_space<vmem>>, %arg14: memref<16x32xf32, #tpu.memory_space<vmem>>) attributes {dimension_semantics = [#tpu.dimension_semantics<arbitrary>], iteration_bounds = array<i64: 1>, scalar_prefetch = 0 : i64, scratch_operands = 0 : i64, tpu.core_type = #tpu.core_type<tc>, window_params = [{pipeline_mode = #tpu.pipeline_mode<synchronous>, transform_indices = @transform_0, window_bounds = array<i64: 16, 32>}, {pipeline_mode = #tpu.pipeline_mode<synchronous>, transform_indices = @transform_1, window_bounds = array<i64: 1, 32>}, {pipeline_mode = #tpu.pipeline_mode<synchronous>, transform_indices = @transform_2, window_bounds = array<i64: 1, 32>}, {pipeline_mode = #tpu.pipeline_mode<synchronous>, transform_indices = @transform_3, window_bounds = array<i64: 32, 96>}, {pipeline_mode = #tpu.pipeline_mode<synchronous>, transform_indices = @transform_4, window_bounds = array<i64: 1, 96>}, {pipeline_mode = #tpu.pipeline_mode<synchronous>, transform_indices = @transform_5, window_bounds = array<i64: 32, 32>}, {pipeline_mode = #tpu.pipeline_mode<synchronous>, transform_indices = @transform_6, window_bounds = array<i64: 1, 32>}, {pipeline_mode = #tpu.pipeline_mode<synchronous>, transform_indices = @transform_7, window_bounds = array<i64: 1, 32>}, {pipeline_mode = #tpu.pipeline_mode<synchronous>, transform_indices = @transform_8, window_bounds = array<i64: 1, 32>}, {pipeline_mode = #tpu.pipeline_mode<synchronous>, transform_indices = @transform_9, window_bounds = array<i64: 32, 64>}, {pipeline_mode = #tpu.pipeline_mode<synchronous>, transform_indices = @transform_10, window_bounds = array<i64: 1, 64>}, {pipeline_mode = #tpu.pipeline_mode<synchronous>, transform_indices = @transform_11, window_bounds = array<i64: 64, 32>}, {pipeline_mode = #tpu.pipeline_mode<synchronous>, transform_indices = @transform_12, window_bounds = array<i64: 1, 32>}, {pipeline_mode = #tpu.pipeline_mode<synchronous>, transform_indices = @transform_13, window_bounds = array<i64: 16, 32>}]} {
    %c0 = arith.constant 0 : index
    %c0_0 = arith.constant 0 : index
    %0 = vector.load %arg1[%c0, %c0_0] : memref<16x32xf32, #tpu.memory_space<vmem>>, vector<16x32xf32>
    %c0_1 = arith.constant 0 : index
    %c0_2 = arith.constant 0 : index
    %1 = vector.load %arg2[%c0_1, %c0_2] : memref<1x32xf32, #tpu.memory_space<vmem>>, vector<1x32xf32>
    %2 = vector.shape_cast %1 : vector<1x32xf32> to vector<32xf32>
    %c0_3 = arith.constant 0 : index
    %c0_4 = arith.constant 0 : index
    %3 = vector.load %arg3[%c0_3, %c0_4] : memref<1x32xf32, #tpu.memory_space<vmem>>, vector<1x32xf32>
    %4 = vector.shape_cast %3 : vector<1x32xf32> to vector<32xf32>
    %cst = arith.constant dense<0.000000e+00> : vector<16xf32>
    %5 = vector.multi_reduction <add>, %0, %cst [1] : vector<16x32xf32> to vector<16xf32>
    %6 = vector.shape_cast %5 : vector<16xf32> to vector<16x1xf32>
    %cst_5 = arith.constant 3.200000e+01 : f32
    %7 = vector.broadcast %cst_5 : f32 to vector<16x1xf32>
    %8 = arith.divf %6, %7 : vector<16x1xf32>
    %9 = vector.broadcast %8 : vector<16x1xf32> to vector<16x32xf32>
    %10 = arith.subf %0, %9 : vector<16x32xf32>
    %11 = arith.mulf %10, %10 : vector<16x32xf32>
    %cst_6 = arith.constant dense<0.000000e+00> : vector<16xf32>
    %12 = vector.multi_reduction <add>, %11, %cst_6 [1] : vector<16x32xf32> to vector<16xf32>
    %13 = vector.shape_cast %12 : vector<16xf32> to vector<16x1xf32>
    %cst_7 = arith.constant 3.200000e+01 : f32
    %14 = vector.broadcast %cst_7 : f32 to vector<16x1xf32>
    %15 = arith.divf %13, %14 : vector<16x1xf32>
    %16 = vector.broadcast %8 : vector<16x1xf32> to vector<16x32xf32>
    %17 = arith.subf %0, %16 : vector<16x32xf32>
    %cst_8 = arith.constant 9.99999997E-7 : f32
    %18 = vector.broadcast %cst_8 : f32 to vector<16x1xf32>
    %19 = arith.addf %15, %18 : vector<16x1xf32>
    %20 = math.rsqrt %19 : vector<16x1xf32>
    %21 = vector.broadcast %20 : vector<16x1xf32> to vector<16x32xf32>
    %22 = arith.mulf %17, %21 : vector<16x32xf32>
    %23 = vector.shape_cast %2 : vector<32xf32> to vector<1x32xf32>
    %24 = vector.broadcast %23 : vector<1x32xf32> to vector<16x32xf32>
    %25 = arith.mulf %22, %24 : vector<16x32xf32>
    %26 = vector.shape_cast %4 : vector<32xf32> to vector<1x32xf32>
    %27 = vector.broadcast %26 : vector<1x32xf32> to vector<16x32xf32>
    %28 = arith.addf %25, %27 : vector<16x32xf32>
    %c0_9 = arith.constant 0 : index
    %c0_10 = arith.constant 0 : index
    %29 = vector.load %arg4[%c0_9, %c0_10] : memref<32x96xf32, #tpu.memory_space<vmem>>, vector<32x96xf32>
    %cst_11 = arith.constant dense<0.000000e+00> : vector<16x96xf32>
    %30 = tpu.matmul %28, %29, %cst_11 {dimension_numbers = #tpu.dot_dimension_numbers<[1], [0], [0], [1], [0, 0, 1, 1], [], []>} : vector<16x32xf32>, vector<32x96xf32>, vector<16x96xf32> -> vector<16x96xf32>
    %c0_12 = arith.constant 0 : index
    %c0_13 = arith.constant 0 : index
    %31 = vector.load %arg5[%c0_12, %c0_13] : memref<1x96xf32, #tpu.memory_space<vmem>>, vector<1x96xf32>
    %32 = vector.shape_cast %31 : vector<1x96xf32> to vector<96xf32>
    %33 = vector.shape_cast %32 : vector<96xf32> to vector<1x96xf32>
    %34 = vector.broadcast %33 : vector<1x96xf32> to vector<16x96xf32>
    %35 = arith.addf %30, %34 : vector<16x96xf32>
    %c0_14 = arith.constant 0 : index
    %c0_15 = arith.constant 0 : index
    %36 = vector.load %arg6[%c0_14, %c0_15] : memref<32x32xf32, #tpu.memory_space<vmem>>, vector<32x32xf32>
    %cst_16 = arith.constant 0.000000e+00 : f32
    %37 = vector.broadcast %cst_16 : f32 to vector<16x32xf32>
    %38 = vector.extract_strided_slice %35 {offsets = [0, 0], sizes = [16, 8], strides = [1, 1]} : vector<16x96xf32> to vector<16x8xf32>
    %39 = vector.shape_cast %38 : vector<16x8xf32> to vector<2x8x8xf32>
    %40 = vector.extract_strided_slice %35 {offsets = [0, 32], sizes = [16, 8], strides = [1, 1]} : vector<16x96xf32> to vector<16x8xf32>
    %41 = vector.shape_cast %40 : vector<16x8xf32> to vector<2x8x8xf32>
    %42 = vector.extract_strided_slice %35 {offsets = [0, 64], sizes = [16, 8], strides = [1, 1]} : vector<16x96xf32> to vector<16x8xf32>
    %43 = vector.shape_cast %42 : vector<16x8xf32> to vector<2x8x8xf32>
    "tpu.trace_start"() <{level = 10 : i32, message = "bqd,bkd->bqk"}> : () -> ()
    %cst_17 = arith.constant dense<0.000000e+00> : vector<2x8x8xf32>
    %44 = tpu.matmul %39, %41, %cst_17 {dimension_numbers = #tpu.dot_dimension_numbers<[2], [2], [1], [1], [0, 0, 0, 1, 1, 1], [0], [0]>} : vector<2x8x8xf32>, vector<2x8x8xf32>, vector<2x8x8xf32> -> vector<2x8x8xf32>
    "tpu.trace_stop"() : () -> ()
    %cst_18 = arith.constant dense<0xFF800000> : vector<2x8xf32>
    %45 = vector.multi_reduction <maximumf>, %44, %cst_18 [2] : vector<2x8x8xf32> to vector<2x8xf32>
    %46 = vector.shape_cast %45 : vector<2x8xf32> to vector<2x8x1xf32>
    %47 = vector.broadcast %46 : vector<2x8x1xf32> to vector<2x8x8xf32>
    %48 = arith.subf %44, %47 : vector<2x8x8xf32>
    %49 = math.exp %48 : vector<2x8x8xf32>
    %cst_19 = arith.constant dense<0.000000e+00> : vector<2x8xf32>
    %50 = vector.multi_reduction <add>, %49, %cst_19 [2] : vector<2x8x8xf32> to vector<2x8xf32>
    %51 = vector.shape_cast %50 : vector<2x8xf32> to vector<2x8x1xf32>
    %52 = tpu.reciprocal %51 {approx = true} : vector<2x8x1xf32> -> vector<2x8x1xf32>
    %53 = vector.broadcast %52 : vector<2x8x1xf32> to vector<2x8x8xf32>
    %54 = arith.mulf %49, %53 : vector<2x8x8xf32>
    "tpu.trace_start"() <{level = 10 : i32, message = "bqk,bkd->bqd"}> : () -> ()
    %cst_20 = arith.constant dense<0.000000e+00> : vector<2x8x8xf32>
    %55 = tpu.matmul %54, %43, %cst_20 {dimension_numbers = #tpu.dot_dimension_numbers<[2], [1], [1], [2], [0, 0, 0, 1, 1, 2], [0], [0]>} : vector<2x8x8xf32>, vector<2x8x8xf32>, vector<2x8x8xf32> -> vector<2x8x8xf32>
    "tpu.trace_stop"() : () -> ()
    %56 = vector.shape_cast %55 : vector<2x8x8xf32> to vector<16x8xf32>
    %57 = vector.extract_strided_slice %36 {offsets = [0, 0], sizes = [8, 32], strides = [1, 1]} : vector<32x32xf32> to vector<8x32xf32>
    %cst_21 = arith.constant dense<0.000000e+00> : vector<16x32xf32>
    %58 = tpu.matmul %56, %57, %cst_21 {dimension_numbers = #tpu.dot_dimension_numbers<[1], [0], [0], [1], [0, 0, 1, 1], [], []>} : vector<16x8xf32>, vector<8x32xf32>, vector<16x32xf32> -> vector<16x32xf32>
    %59 = arith.addf %37, %58 : vector<16x32xf32>
    %60 = vector.extract_strided_slice %35 {offsets = [0, 8], sizes = [16, 8], strides = [1, 1]} : vector<16x96xf32> to vector<16x8xf32>
    %61 = vector.shape_cast %60 : vector<16x8xf32> to vector<2x8x8xf32>
    %62 = vector.extract_strided_slice %35 {offsets = [0, 40], sizes = [16, 8], strides = [1, 1]} : vector<16x96xf32> to vector<16x8xf32>
    %63 = vector.shape_cast %62 : vector<16x8xf32> to vector<2x8x8xf32>
    %64 = vector.extract_strided_slice %35 {offsets = [0, 72], sizes = [16, 8], strides = [1, 1]} : vector<16x96xf32> to vector<16x8xf32>
    %65 = vector.shape_cast %64 : vector<16x8xf32> to vector<2x8x8xf32>
    "tpu.trace_start"() <{level = 10 : i32, message = "bqd,bkd->bqk"}> : () -> ()
    %cst_22 = arith.constant dense<0.000000e+00> : vector<2x8x8xf32>
    %66 = tpu.matmul %61, %63, %cst_22 {dimension_numbers = #tpu.dot_dimension_numbers<[2], [2], [1], [1], [0, 0, 0, 1, 1, 1], [0], [0]>} : vector<2x8x8xf32>, vector<2x8x8xf32>, vector<2x8x8xf32> -> vector<2x8x8xf32>
    "tpu.trace_stop"() : () -> ()
    %cst_23 = arith.constant dense<0xFF800000> : vector<2x8xf32>
    %67 = vector.multi_reduction <maximumf>, %66, %cst_23 [2] : vector<2x8x8xf32> to vector<2x8xf32>
    %68 = vector.shape_cast %67 : vector<2x8xf32> to vector<2x8x1xf32>
    %69 = vector.broadcast %68 : vector<2x8x1xf32> to vector<2x8x8xf32>
    %70 = arith.subf %66, %69 : vector<2x8x8xf32>
    %71 = math.exp %70 : vector<2x8x8xf32>
    %cst_24 = arith.constant dense<0.000000e+00> : vector<2x8xf32>
    %72 = vector.multi_reduction <add>, %71, %cst_24 [2] : vector<2x8x8xf32> to vector<2x8xf32>
    %73 = vector.shape_cast %72 : vector<2x8xf32> to vector<2x8x1xf32>
    %74 = tpu.reciprocal %73 {approx = true} : vector<2x8x1xf32> -> vector<2x8x1xf32>
    %75 = vector.broadcast %74 : vector<2x8x1xf32> to vector<2x8x8xf32>
    %76 = arith.mulf %71, %75 : vector<2x8x8xf32>
    "tpu.trace_start"() <{level = 10 : i32, message = "bqk,bkd->bqd"}> : () -> ()
    %cst_25 = arith.constant dense<0.000000e+00> : vector<2x8x8xf32>
    %77 = tpu.matmul %76, %65, %cst_25 {dimension_numbers = #tpu.dot_dimension_numbers<[2], [1], [1], [2], [0, 0, 0, 1, 1, 2], [0], [0]>} : vector<2x8x8xf32>, vector<2x8x8xf32>, vector<2x8x8xf32> -> vector<2x8x8xf32>
    "tpu.trace_stop"() : () -> ()
    %78 = vector.shape_cast %77 : vector<2x8x8xf32> to vector<16x8xf32>
    %79 = vector.extract_strided_slice %36 {offsets = [8, 0], sizes = [8, 32], strides = [1, 1]} : vector<32x32xf32> to vector<8x32xf32>
    %cst_26 = arith.constant dense<0.000000e+00> : vector<16x32xf32>
    %80 = tpu.matmul %78, %79, %cst_26 {dimension_numbers = #tpu.dot_dimension_numbers<[1], [0], [0], [1], [0, 0, 1, 1], [], []>} : vector<16x8xf32>, vector<8x32xf32>, vector<16x32xf32> -> vector<16x32xf32>
    %81 = arith.addf %59, %80 : vector<16x32xf32>
    %82 = vector.extract_strided_slice %35 {offsets = [0, 16], sizes = [16, 8], strides = [1, 1]} : vector<16x96xf32> to vector<16x8xf32>
    %83 = vector.shape_cast %82 : vector<16x8xf32> to vector<2x8x8xf32>
    %84 = vector.extract_strided_slice %35 {offsets = [0, 48], sizes = [16, 8], strides = [1, 1]} : vector<16x96xf32> to vector<16x8xf32>
    %85 = vector.shape_cast %84 : vector<16x8xf32> to vector<2x8x8xf32>
    %86 = vector.extract_strided_slice %35 {offsets = [0, 80], sizes = [16, 8], strides = [1, 1]} : vector<16x96xf32> to vector<16x8xf32>
    %87 = vector.shape_cast %86 : vector<16x8xf32> to vector<2x8x8xf32>
    "tpu.trace_start"() <{level = 10 : i32, message = "bqd,bkd->bqk"}> : () -> ()
    %cst_27 = arith.constant dense<0.000000e+00> : vector<2x8x8xf32>
    %88 = tpu.matmul %83, %85, %cst_27 {dimension_numbers = #tpu.dot_dimension_numbers<[2], [2], [1], [1], [0, 0, 0, 1, 1, 1], [0], [0]>} : vector<2x8x8xf32>, vector<2x8x8xf32>, vector<2x8x8xf32> -> vector<2x8x8xf32>
    "tpu.trace_stop"() : () -> ()
    %cst_28 = arith.constant dense<0xFF800000> : vector<2x8xf32>
    %89 = vector.multi_reduction <maximumf>, %88, %cst_28 [2] : vector<2x8x8xf32> to vector<2x8xf32>
    %90 = vector.shape_cast %89 : vector<2x8xf32> to vector<2x8x1xf32>
    %91 = vector.broadcast %90 : vector<2x8x1xf32> to vector<2x8x8xf32>
    %92 = arith.subf %88, %91 : vector<2x8x8xf32>
    %93 = math.exp %92 : vector<2x8x8xf32>
    %cst_29 = arith.constant dense<0.000000e+00> : vector<2x8xf32>
    %94 = vector.multi_reduction <add>, %93, %cst_29 [2] : vector<2x8x8xf32> to vector<2x8xf32>
    %95 = vector.shape_cast %94 : vector<2x8xf32> to vector<2x8x1xf32>
    %96 = tpu.reciprocal %95 {approx = true} : vector<2x8x1xf32> -> vector<2x8x1xf32>
    %97 = vector.broadcast %96 : vector<2x8x1xf32> to vector<2x8x8xf32>
    %98 = arith.mulf %93, %97 : vector<2x8x8xf32>
    "tpu.trace_start"() <{level = 10 : i32, message = "bqk,bkd->bqd"}> : () -> ()
    %cst_30 = arith.constant dense<0.000000e+00> : vector<2x8x8xf32>
    %99 = tpu.matmul %98, %87, %cst_30 {dimension_numbers = #tpu.dot_dimension_numbers<[2], [1], [1], [2], [0, 0, 0, 1, 1, 2], [0], [0]>} : vector<2x8x8xf32>, vector<2x8x8xf32>, vector<2x8x8xf32> -> vector<2x8x8xf32>
    "tpu.trace_stop"() : () -> ()
    %100 = vector.shape_cast %99 : vector<2x8x8xf32> to vector<16x8xf32>
    %101 = vector.extract_strided_slice %36 {offsets = [16, 0], sizes = [8, 32], strides = [1, 1]} : vector<32x32xf32> to vector<8x32xf32>
    %cst_31 = arith.constant dense<0.000000e+00> : vector<16x32xf32>
    %102 = tpu.matmul %100, %101, %cst_31 {dimension_numbers = #tpu.dot_dimension_numbers<[1], [0], [0], [1], [0, 0, 1, 1], [], []>} : vector<16x8xf32>, vector<8x32xf32>, vector<16x32xf32> -> vector<16x32xf32>
    %103 = arith.addf %81, %102 : vector<16x32xf32>
    %104 = vector.extract_strided_slice %35 {offsets = [0, 24], sizes = [16, 8], strides = [1, 1]} : vector<16x96xf32> to vector<16x8xf32>
    %105 = vector.shape_cast %104 : vector<16x8xf32> to vector<2x8x8xf32>
    %106 = vector.extract_strided_slice %35 {offsets = [0, 56], sizes = [16, 8], strides = [1, 1]} : vector<16x96xf32> to vector<16x8xf32>
    %107 = vector.shape_cast %106 : vector<16x8xf32> to vector<2x8x8xf32>
    %108 = vector.extract_strided_slice %35 {offsets = [0, 88], sizes = [16, 8], strides = [1, 1]} : vector<16x96xf32> to vector<16x8xf32>
    %109 = vector.shape_cast %108 : vector<16x8xf32> to vector<2x8x8xf32>
    "tpu.trace_start"() <{level = 10 : i32, message = "bqd,bkd->bqk"}> : () -> ()
    %cst_32 = arith.constant dense<0.000000e+00> : vector<2x8x8xf32>
    %110 = tpu.matmul %105, %107, %cst_32 {dimension_numbers = #tpu.dot_dimension_numbers<[2], [2], [1], [1], [0, 0, 0, 1, 1, 1], [0], [0]>} : vector<2x8x8xf32>, vector<2x8x8xf32>, vector<2x8x8xf32> -> vector<2x8x8xf32>
    "tpu.trace_stop"() : () -> ()
    %cst_33 = arith.constant dense<0xFF800000> : vector<2x8xf32>
    %111 = vector.multi_reduction <maximumf>, %110, %cst_33 [2] : vector<2x8x8xf32> to vector<2x8xf32>
    %112 = vector.shape_cast %111 : vector<2x8xf32> to vector<2x8x1xf32>
    %113 = vector.broadcast %112 : vector<2x8x1xf32> to vector<2x8x8xf32>
    %114 = arith.subf %110, %113 : vector<2x8x8xf32>
    %115 = math.exp %114 : vector<2x8x8xf32>
    %cst_34 = arith.constant dense<0.000000e+00> : vector<2x8xf32>
    %116 = vector.multi_reduction <add>, %115, %cst_34 [2] : vector<2x8x8xf32> to vector<2x8xf32>
    %117 = vector.shape_cast %116 : vector<2x8xf32> to vector<2x8x1xf32>
    %118 = tpu.reciprocal %117 {approx = true} : vector<2x8x1xf32> -> vector<2x8x1xf32>
    %119 = vector.broadcast %118 : vector<2x8x1xf32> to vector<2x8x8xf32>
    %120 = arith.mulf %115, %119 : vector<2x8x8xf32>
    "tpu.trace_start"() <{level = 10 : i32, message = "bqk,bkd->bqd"}> : () -> ()
    %cst_35 = arith.constant dense<0.000000e+00> : vector<2x8x8xf32>
    %121 = tpu.matmul %120, %109, %cst_35 {dimension_numbers = #tpu.dot_dimension_numbers<[2], [1], [1], [2], [0, 0, 0, 1, 1, 2], [0], [0]>} : vector<2x8x8xf32>, vector<2x8x8xf32>, vector<2x8x8xf32> -> vector<2x8x8xf32>
    "tpu.trace_stop"() : () -> ()
    %122 = vector.shape_cast %121 : vector<2x8x8xf32> to vector<16x8xf32>
    %123 = vector.extract_strided_slice %36 {offsets = [24, 0], sizes = [8, 32], strides = [1, 1]} : vector<32x32xf32> to vector<8x32xf32>
    %cst_36 = arith.constant dense<0.000000e+00> : vector<16x32xf32>
    %124 = tpu.matmul %122, %123, %cst_36 {dimension_numbers = #tpu.dot_dimension_numbers<[1], [0], [0], [1], [0, 0, 1, 1], [], []>} : vector<16x8xf32>, vector<8x32xf32>, vector<16x32xf32> -> vector<16x32xf32>
    %125 = arith.addf %103, %124 : vector<16x32xf32>
    %c0_37 = arith.constant 0 : index
    %c0_38 = arith.constant 0 : index
    %126 = vector.load %arg7[%c0_37, %c0_38] : memref<1x32xf32, #tpu.memory_space<vmem>>, vector<1x32xf32>
    %127 = vector.shape_cast %126 : vector<1x32xf32> to vector<32xf32>
    %128 = vector.shape_cast %127 : vector<32xf32> to vector<1x32xf32>
    %129 = vector.broadcast %128 : vector<1x32xf32> to vector<16x32xf32>
    %130 = arith.addf %125, %129 : vector<16x32xf32>
    %131 = arith.addf %130, %0 : vector<16x32xf32>
    %c0_39 = arith.constant 0 : index
    %c0_40 = arith.constant 0 : index
    %132 = vector.load %arg8[%c0_39, %c0_40] : memref<1x32xf32, #tpu.memory_space<vmem>>, vector<1x32xf32>
    %133 = vector.shape_cast %132 : vector<1x32xf32> to vector<32xf32>
    %c0_41 = arith.constant 0 : index
    %c0_42 = arith.constant 0 : index
    %134 = vector.load %arg9[%c0_41, %c0_42] : memref<1x32xf32, #tpu.memory_space<vmem>>, vector<1x32xf32>
    %135 = vector.shape_cast %134 : vector<1x32xf32> to vector<32xf32>
    %cst_43 = arith.constant dense<0.000000e+00> : vector<16xf32>
    %136 = vector.multi_reduction <add>, %131, %cst_43 [1] : vector<16x32xf32> to vector<16xf32>
    %137 = vector.shape_cast %136 : vector<16xf32> to vector<16x1xf32>
    %cst_44 = arith.constant 3.200000e+01 : f32
    %138 = vector.broadcast %cst_44 : f32 to vector<16x1xf32>
    %139 = arith.divf %137, %138 : vector<16x1xf32>
    %140 = vector.broadcast %139 : vector<16x1xf32> to vector<16x32xf32>
    %141 = arith.subf %131, %140 : vector<16x32xf32>
    %142 = arith.mulf %141, %141 : vector<16x32xf32>
    %cst_45 = arith.constant dense<0.000000e+00> : vector<16xf32>
    %143 = vector.multi_reduction <add>, %142, %cst_45 [1] : vector<16x32xf32> to vector<16xf32>
    %144 = vector.shape_cast %143 : vector<16xf32> to vector<16x1xf32>
    %cst_46 = arith.constant 3.200000e+01 : f32
    %145 = vector.broadcast %cst_46 : f32 to vector<16x1xf32>
    %146 = arith.divf %144, %145 : vector<16x1xf32>
    %147 = vector.broadcast %139 : vector<16x1xf32> to vector<16x32xf32>
    %148 = arith.subf %131, %147 : vector<16x32xf32>
    %cst_47 = arith.constant 9.99999997E-7 : f32
    %149 = vector.broadcast %cst_47 : f32 to vector<16x1xf32>
    %150 = arith.addf %146, %149 : vector<16x1xf32>
    %151 = math.rsqrt %150 : vector<16x1xf32>
    %152 = vector.broadcast %151 : vector<16x1xf32> to vector<16x32xf32>
    %153 = arith.mulf %148, %152 : vector<16x32xf32>
    %154 = vector.shape_cast %133 : vector<32xf32> to vector<1x32xf32>
    %155 = vector.broadcast %154 : vector<1x32xf32> to vector<16x32xf32>
    %156 = arith.mulf %153, %155 : vector<16x32xf32>
    %157 = vector.shape_cast %135 : vector<32xf32> to vector<1x32xf32>
    %158 = vector.broadcast %157 : vector<1x32xf32> to vector<16x32xf32>
    %159 = arith.addf %156, %158 : vector<16x32xf32>
    %c0_48 = arith.constant 0 : index
    %c0_49 = arith.constant 0 : index
    %160 = vector.load %arg10[%c0_48, %c0_49] : memref<32x64xf32, #tpu.memory_space<vmem>>, vector<32x64xf32>
    %cst_50 = arith.constant dense<0.000000e+00> : vector<16x64xf32>
    %161 = tpu.matmul %159, %160, %cst_50 {dimension_numbers = #tpu.dot_dimension_numbers<[1], [0], [0], [1], [0, 0, 1, 1], [], []>} : vector<16x32xf32>, vector<32x64xf32>, vector<16x64xf32> -> vector<16x64xf32>
    %c0_51 = arith.constant 0 : index
    %c0_52 = arith.constant 0 : index
    %162 = vector.load %arg11[%c0_51, %c0_52] : memref<1x64xf32, #tpu.memory_space<vmem>>, vector<1x64xf32>
    %163 = vector.shape_cast %162 : vector<1x64xf32> to vector<64xf32>
    %164 = vector.shape_cast %163 : vector<64xf32> to vector<1x64xf32>
    %165 = vector.broadcast %164 : vector<1x64xf32> to vector<16x64xf32>
    %166 = arith.addf %161, %165 : vector<16x64xf32>
    %cst_53 = arith.constant 5.000000e-01 : f32
    %167 = vector.broadcast %cst_53 : f32 to vector<16x64xf32>
    %168 = arith.mulf %167, %166 : vector<16x64xf32>
    %cst_54 = arith.constant 0.707106769 : f32
    %169 = vector.broadcast %cst_54 : f32 to vector<16x64xf32>
    %170 = arith.mulf %166, %169 : vector<16x64xf32>
    %171 = math.absf %170 : vector<16x64xf32>
    %cst_55 = arith.constant 0.327591091 : f32
    %172 = vector.broadcast %cst_55 : f32 to vector<16x64xf32>
    %173 = arith.mulf %172, %171 : vector<16x64xf32>
    %cst_56 = arith.constant 1.000000e+00 : f32
    %174 = vector.broadcast %cst_56 : f32 to vector<16x64xf32>
    %175 = arith.addf %174, %173 : vector<16x64xf32>
    %cst_57 = arith.constant 1.000000e+00 : f32
    %176 = vector.broadcast %cst_57 : f32 to vector<16x64xf32>
    %177 = arith.divf %176, %175 : vector<16x64xf32>
    %cst_58 = arith.constant 1.06140542 : f32
    %178 = vector.broadcast %cst_58 : f32 to vector<16x64xf32>
    %179 = arith.mulf %178, %177 : vector<16x64xf32>
    %cst_59 = arith.constant -1.45315206 : f32
    %180 = vector.broadcast %cst_59 : f32 to vector<16x64xf32>
    %181 = arith.addf %179, %180 : vector<16x64xf32>
    %182 = arith.mulf %181, %177 : vector<16x64xf32>
    %cst_60 = arith.constant 1.42141378 : f32
    %183 = vector.broadcast %cst_60 : f32 to vector<16x64xf32>
    %184 = arith.addf %182, %183 : vector<16x64xf32>
    %185 = arith.mulf %184, %177 : vector<16x64xf32>
    %cst_61 = arith.constant -0.284496725 : f32
    %186 = vector.broadcast %cst_61 : f32 to vector<16x64xf32>
    %187 = arith.addf %185, %186 : vector<16x64xf32>
    %188 = arith.mulf %187, %177 : vector<16x64xf32>
    %cst_62 = arith.constant 0.254829586 : f32
    %189 = vector.broadcast %cst_62 : f32 to vector<16x64xf32>
    %190 = arith.addf %188, %189 : vector<16x64xf32>
    %191 = arith.mulf %190, %177 : vector<16x64xf32>
    %cst_63 = arith.constant 0.000000e+00 : f32
    %192 = vector.broadcast %cst_63 : f32 to vector<16x64xf32>
    %193 = arith.subf %192, %171 : vector<16x64xf32>
    %194 = arith.mulf %193, %171 : vector<16x64xf32>
    %195 = math.exp %194 : vector<16x64xf32>
    %196 = arith.mulf %191, %195 : vector<16x64xf32>
    %cst_64 = arith.constant 1.000000e+00 : f32
    %197 = vector.broadcast %cst_64 : f32 to vector<16x64xf32>
    %198 = arith.subf %197, %196 : vector<16x64xf32>
    %cst_65 = arith.constant 0.000000e+00 : f32
    %199 = vector.broadcast %cst_65 : f32 to vector<16x64xf32>
    %200 = arith.cmpf olt, %170, %199 : vector<16x64xf32>
    %cst_66 = arith.constant 0.000000e+00 : f32
    %201 = vector.broadcast %cst_66 : f32 to vector<16x64xf32>
    %202 = arith.subf %201, %198 : vector<16x64xf32>
    %203 = arith.select %200, %202, %198 : vector<16x64xi1>, vector<16x64xf32>
    %cst_67 = arith.constant 1.000000e+00 : f32
    %204 = vector.broadcast %cst_67 : f32 to vector<16x64xf32>
    %205 = arith.addf %204, %203 : vector<16x64xf32>
    %206 = arith.mulf %168, %205 : vector<16x64xf32>
    %c0_68 = arith.constant 0 : index
    %c0_69 = arith.constant 0 : index
    %207 = vector.load %arg12[%c0_68, %c0_69] : memref<64x32xf32, #tpu.memory_space<vmem>>, vector<64x32xf32>
    %cst_70 = arith.constant dense<0.000000e+00> : vector<16x32xf32>
    %208 = tpu.matmul %206, %207, %cst_70 {dimension_numbers = #tpu.dot_dimension_numbers<[1], [0], [0], [1], [0, 0, 1, 1], [], []>} : vector<16x64xf32>, vector<64x32xf32>, vector<16x32xf32> -> vector<16x32xf32>
    %c0_71 = arith.constant 0 : index
    %c0_72 = arith.constant 0 : index
    %209 = vector.load %arg13[%c0_71, %c0_72] : memref<1x32xf32, #tpu.memory_space<vmem>>, vector<1x32xf32>
    %210 = vector.shape_cast %209 : vector<1x32xf32> to vector<32xf32>
    %211 = vector.shape_cast %210 : vector<32xf32> to vector<1x32xf32>
    %212 = vector.broadcast %211 : vector<1x32xf32> to vector<16x32xf32>
    %213 = arith.addf %208, %212 : vector<16x32xf32>
    %214 = arith.addf %213, %131 : vector<16x32xf32>
    %c0_73 = arith.constant 0 : index
    %c0_74 = arith.constant 0 : index
    %215 = vector.load %arg14[%c0_73, %c0_74] : memref<16x32xf32, #tpu.memory_space<vmem>>, vector<16x32xf32>
    tpu.vector_store %arg14[%c0_73, %c0_74], %214 {strides = array<i32>} : memref<16x32xf32, #tpu.memory_space<vmem>>, vector<16x32xf32>,
    return
  }
  func.func @transform_0(%arg0: i32) -> (i32, i32) {
    %c0_i32 = arith.constant 0 : i32
    %c0_i32_0 = arith.constant 0 : i32
    %c0_i32_1 = arith.constant 0 : i32
    return %c0_i32, %c0_i32_0 : i32, i32
  }
  func.func @transform_1(%arg0: i32) -> (i32, i32) {
    %c0_i32 = arith.constant 0 : i32
    %c0_i32_0 = arith.constant 0 : i32
    %c0_i32_1 = arith.constant 0 : i32
    return %c0_i32, %c0_i32_0 : i32, i32
  }
  func.func @transform_2(%arg0: i32) -> (i32, i32) {
    %c0_i32 = arith.constant 0 : i32
    %c0_i32_0 = arith.constant 0 : i32
    %c0_i32_1 = arith.constant 0 : i32
    return %c0_i32, %c0_i32_0 : i32, i32
  }
  func.func @transform_3(%arg0: i32) -> (i32, i32) {
    %c0_i32 = arith.constant 0 : i32
    %c0_i32_0 = arith.constant 0 : i32
    %c0_i32_1 = arith.constant 0 : i32
    return %c0_i32, %c0_i32_0 : i32, i32
  }
  func.func @transform_4(%arg0: i32) -> (i32, i32) {
    %c0_i32 = arith.constant 0 : i32
    %c0_i32_0 = arith.constant 0 : i32
    %c0_i32_1 = arith.constant 0 : i32
    return %c0_i32, %c0_i32_0 : i32, i32
  }
  func.func @transform_5(%arg0: i32) -> (i32, i32) {
    %c0_i32 = arith.constant 0 : i32
    %c0_i32_0 = arith.constant 0 : i32
    %c0_i32_1 = arith.constant 0 : i32
    return %c0_i32, %c0_i32_0 : i32, i32
  }
  func.func @transform_6(%arg0: i32) -> (i32, i32) {
    %c0_i32 = arith.constant 0 : i32
    %c0_i32_0 = arith.constant 0 : i32
    %c0_i32_1 = arith.constant 0 : i32
    return %c0_i32, %c0_i32_0 : i32, i32
  }
  func.func @transform_7(%arg0: i32) -> (i32, i32) {
    %c0_i32 = arith.constant 0 : i32
    %c0_i32_0 = arith.constant 0 : i32
    %c0_i32_1 = arith.constant 0 : i32
    return %c0_i32, %c0_i32_0 : i32, i32
  }
  func.func @transform_8(%arg0: i32) -> (i32, i32) {
    %c0_i32 = arith.constant 0 : i32
    %c0_i32_0 = arith.constant 0 : i32
    %c0_i32_1 = arith.constant 0 : i32
    return %c0_i32, %c0_i32_0 : i32, i32
  }
  func.func @transform_9(%arg0: i32) -> (i32, i32) {
    %c0_i32 = arith.constant 0 : i32
    %c0_i32_0 = arith.constant 0 : i32
    %c0_i32_1 = arith.constant 0 : i32
    return %c0_i32, %c0_i32_0 : i32, i32
  }
  func.func @transform_10(%arg0: i32) -> (i32, i32) {
    %c0_i32 = arith.constant 0 : i32
    %c0_i32_0 = arith.constant 0 : i32
    %c0_i32_1 = arith.constant 0 : i32
    return %c0_i32, %c0_i32_0 : i32, i32
  }
  func.func @transform_11(%arg0: i32) -> (i32, i32) {
    %c0_i32 = arith.constant 0 : i32
    %c0_i32_0 = arith.constant 0 : i32
    %c0_i32_1 = arith.constant 0 : i32
    return %c0_i32, %c0_i32_0 : i32, i32
  }
  func.func @transform_12(%arg0: i32) -> (i32, i32) {
    %c0_i32 = arith.constant 0 : i32
    %c0_i32_0 = arith.constant 0 : i32
    %c0_i32_1 = arith.constant 0 : i32
    return %c0_i32, %c0_i32_0 : i32, i32
  }
  func.func @transform_13(%arg0: i32) -> (i32, i32) {
    %c0_i32 = arith.constant 0 : i32
    %c0_i32_0 = arith.constant 0 : i32
    %c0_i32_1 = arith.constant 0 : i32
    return %c0_i32, %c0_i32_0 : i32, i32
  }
}

</mosaic_0001>

<bundles_post_ra>
// kernel: tpu_custom_call.1
= control target key start
LH: loop header
LB: loop body
LE: loop exit
PB: predicated region body
PF: predicated region fallthrough
CT: control target
= control target key end

     0   :  { %18 = vsyncpa [#allocation3], 0  ;;  %s2946_s0 = inlined_call_operand.hbm [shape: f32[16,32], index: 0, kind: input, shape index: {}]   ;;  %s2947_s1 = inlined_call_operand.vmem [shape: f32[1,32], index: 1, kind: input, shape index: {}]   ;;  %s2948_s2 = inlined_call_operand.vmem [shape: f32[1,32], index: 2, kind: input, shape index: {}]   ;;  %s2949_s3 = inlined_call_operand.vmem [shape: f32[32,96], index: 3, kind: input, shape index: {}]   ;;  %s2950_s4 = inlined_call_operand.vmem [shape: f32[1,96], index: 4, kind: input, shape index: {}]   ;;  %s2951_s5 = inlined_call_operand.vmem [shape: f32[32,32], index: 5, kind: input, shape index: {}]   ;;  %s2952_s6 = inlined_call_operand.vmem [shape: f32[1,32], index: 6, kind: input, shape index: {}]   ;;  %s2953_s7 = inlined_call_operand.vmem [shape: f32[1,32], index: 7, kind: input, shape index: {}]   ;;  %s2954_s8 = inlined_call_operand.vmem [shape: f32[1,32], index: 8, kind: input, shape index: {}]   ;;  %s2955_s9 = inlined_call_operand.vmem [shape: f32[32,64], index: 9, kind: input, shape index: {}]   ;;  %s2956_s10 = inlined_call_operand.vmem [shape: f32[1,64], index: 10, kind: input, shape index: {}]   ;;  %s2957_s11 = inlined_call_operand.vmem [shape: f32[64,32], index: 11, kind: input, shape index: {}]   ;;  %s2958_s12 = inlined_call_operand.vmem [shape: f32[1,32], index: 12, kind: input, shape index: {}]   ;;  %s2959_s13 = inlined_call_operand.hbm [shape: f32[16,32], index: 13, kind: output, shape index: {}]  }
   0x1   :  { %19 = vsyncpa [#allocation4], 0  ;;  %s2573_s25 = smov [#allocation2]   ;;  %s2525_s29 = scalar_lea.hbm %s2946_s0, 256 }
   0x2   :  { %s25_s26 = sshll.u32 %s2573_s25, 4  ;;  %p2526_p0 = scmp.ne.s32.totalorder %s2946_s0, %s2525_s29  ;;  %s26_s26 = int_to_ptr.vmem [resolvable:$true] %s25_s26 }
   0x3   :  { %p2529_p1 = scmp.lt.u32.totalorder %s2525_s29, %s2946_s0 }
   0x5   :  { %p2531_p2 = pnand %p2529_p1, %p2526_p0 }
   0x7   :  { %2534 = shalt.err (!%p2531_p2)
}
   0x8   :  { %s2535_s17 = scalar_lea.vmem %s26_s26, 256  ;;  %p2540_p4 = scmp.lt.s32.totalorder %s26_s26, %s26_s26 }
   0x9   :  { %p2536_p3 = scmp.ne.s32.totalorder %s26_s26, %s2535_s17  ;;  %p2541_p5 = scmp.lt.s32.totalorder %s2535_s17, %s2535_s17 }
   0xb   :  { %p2542_p6 = por %p2541_p5, %p2540_p4 }
   0xd   :  { %p2543_p7 = pnand %p2542_p6, %p2536_p3 }
   0xf   :  { %2546 = shalt.err (!%p2543_p7)
}
  0x10   :  { %s2574_s18 = smov 128   ;;  %s2575_s19 = smov 8  }
  0x11   :  { %31 = dma.hbm_to_vmem [thread:$0]  %s2946_s0, 256, %s26_s26, [#allocation3], %s2574_s18, %s2574_s18, %s2575_s19  }
  0x12   :  { %2569 = dma.done.wait [#allocation3], 256  }
  0x13   :  { %2570 = vsyncadd [#allocation3], 4294967040  ;;  %vm63_vm0 = vcmask 261120   ;;  %v2675_v0 = vld [vmem:[#allocation2] sm:$0xff]  ;;  %v2677_v1 = vld [vmem:[#allocation2 + $0x8] sm:$0xff]  ;;  %v2576_v36 = vmov 0.0  }
  0x14   :  { %v64_v2 = vsel %vm63_vm0, %v2675_v0, 0.0  ;;  %v67_v3 = vsel %vm63_vm0, %v2677_v1, 0.0  ;;  %v107_v14 = vld [vmem:[%s2949_s3] sm:$0xff]  ;;  %v108_v15 = vld [vmem:[%s2949_s3 + $0x8] sm:$0xff]  ;;  %v109_v16 = vld [vmem:[%s2949_s3 + $0x10] sm:$0xff]  ;;  %2302 = vmatprep.subr.mxu0 %v2576_v36  ;;  %vm2577_vm1 = vmmov 0  }
  0x15   :  { %65 = vadd.xlane.f32.xlu0 %v64_v2  ;;  %v2422_v17 = vpack.c.bf16 %v108_v15, %v107_v14  ;;  %v110_v18 = vld [vmem:[%s2949_s3 + $0x18] sm:$0xff]  ;;  %v2169_v27 = vld [vmem:[%s2947_s1] ss:$0 sm:$0xff]  ;;  %2304 = vmatprep.mubr.msk.f32.mxu0 %vm2577_vm1, %v2576_v36  ;;  %s2578_s15 = smov 96   ;;  %vm206_vm2 = vcmask 64512   ;;  %s2580_s16 = smov 120  }
  0x16   :  { %v2426_v19 = vpack.c.bf16 %v110_v18, %v109_v16  ;;  %v2170_v29 = vld [vmem:[%s2948_s2] ss:$0 sm:$0xff]  ;;  %s2581_s17 = smov 80   ;;  %s2582_s20 = smov 64   ;;  %vm2066_vm5 = vcmask 523264  }
  0x17   :  { %2423 = vmatprep.subr.bf16.mxu1 %v2422_v17  ;;  %v2171_v37 = vld [vmem:[%s2950_s4] ss:$0 sm:$0xff]  ;;  %s2579_s4 = smov 88   ;;  %s2583_s21 = smov 56  }
  0x18   :  { %2425 = vmatpush3.bf16.msra.mxu1 %v2422_v17  ;;  %s2584_s0 = smov 112   ;;  %s2585_s22 = smov 48  }
  0x19   :  { %68 = vadd.xlane.f32.xlu0 %v67_v3  ;;  %2427 = vmatprep.subr.bf16.mxu1 %v2426_v19  ;;  %s2586_s23 = smov 72   ;;  %s2587_s24 = smov 104  }
  0x1a   :  { %s2588_s3 = smov 40  }
  0x1c   :  { %2429 = vmatpush3.bf16.msra.mxu1 %v2426_v19 }
  0x1d   :  { %2292 = vmatprep.subr.mxu1 %v2576_v36 }
  0xa2   :  { %v66_v4 = vpop.xlane.xlu0 %65 }
  0xa3   :  { %v71_v5 = vmul.f32 0.03125, %v66_v4 }
  0xa5   :  { %v73_v6 = vsub.f32 %v2675_v0, %v71_v5 }
  0xa6   :  { %v69_v7 = vpop.xlane.xlu0 %68 }
  0xa7   :  { %v72_v8 = vmul.f32 0.03125, %v69_v7  ;;  %v75_v9 = vmul.f32 %v73_v6, %v73_v6 }
  0xa9   :  { %v74_v10 = vsub.f32 %v2677_v1, %v72_v8  ;;  %v77_v11 = vsel %vm63_vm0, %v75_v9, 0.0 }
  0xaa   :  { %78 = vadd.xlane.f32.xlu1 %v77_v11 }
  0xab   :  { %v76_v12 = vmul.f32 %v74_v10, %v74_v10 }
  0xad   :  { %v80_v13 = vsel %vm63_vm0, %v76_v12, 0.0 }
  0xae   :  { %81 = vadd.xlane.f32.xlu1 %v80_v13 }
 0x137   :  { %v79_v20 = vpop.xlane.xlu1 %78 }
 0x138   :  { %v83_v21 = vmul.f32 0.03125, %v79_v20 }
 0x13a   :  { %v85_v22 = vadd.f32 1e-06, %v83_v21 }
 0x13b   :  { %v82_v23 = vpop.xlane.xlu1 %81 }
 0x13c   :  { %2477 = vrsqrt.f32 %v85_v22  ;;  %v84_v24 = vmul.f32 0.03125, %v82_v23 }
 0x13e   :  { %v86_v25 = vadd.f32 1e-06, %v84_v24 }
 0x140   :  { %2479 = vrsqrt.f32 %v86_v25 }
 0x146   :  { %v2478_v26 = vpop.eup %2477 }
 0x147   :  { %v89_v28 = vmul.f32 %v2478_v26, %v73_v6 }
 0x149   :  { %v97_v30 = vmul.f32 %v2169_v27, %v89_v28 }
 0x14a   :  { %v2480_v31 = vpop.eup %2479 }
 0x14b   :  { %v90_v32 = vmul.f32 %v2480_v31, %v74_v10  ;;  %v105_v33 = vadd.f32 %v2170_v29, %v97_v30 }
 0x14d   :  { %v98_v34 = vmul.f32 %v2169_v27, %v90_v32  ;;  %2289 = vmatprep.mubr.msk.f32.mxu1 %vm63_vm0, %v105_v33 }
 0x14f   :  { %v106_v35 = vadd.f32 %v2170_v29, %v98_v34 }
 0x151   :  { %2290 = vmatmul.mubr.msk.f32.vlgmr.msra.gmra.mrb[0].mxu1 %vm63_vm0, %v106_v35 }
 0x152   :  { %2294 = vmatprep.mubr.msk.f32.mxu1 %vm2577_vm1, %v2576_v36 }
 0x224   :  { %v2291_v38 = vpop.f32.mrb[0].mxu1 }
 0x225   :  { %v2716_v39 = vadd.f32 %v2291_v38, %v2171_v37  ;;  %v190_v40 = vpop.f32.mrb[1].mxu1 }
 0x226   :  { %v2718_v41 = vadd.f32 %v2171_v37, %v190_v40 }
 0x227   :  { %282 = vrot.lane.b32.xlu1 %v2716_v39, %s2578_s15 }
 0x228   :  { %204 = vrot.lane.b32.xlu0 %v2718_v41, %s2578_s15 }
 0x299   :  { %v283_v43 = vpop.permute.xlu1 %282 }
 0x29a   :  { %v205_v42 = vpop.permute.xlu0 %204 }
 0x29b   :  { %2293 = vmatpush3.xpose.msk.msra.mxu1 %vm206_vm2, %v205_v42 }
 0x29c   :  { %2297 = vmatprep.subr.mxu1 %v2576_v36 }
 0x29e   :  { %2295 = vmatmul.mubr.msk.f32.vlgmr.msra.gmra.mrb[2].mxu1 %vm206_vm2, %v2718_v41 }
 0x29f   :  { %2298 = vmatpush3.xpose.msk.msra.mxu1 %vm206_vm2, %v283_v43  ;;  %2299 = vmatprep.mubr.msk.f32.mxu1 %vm2577_vm1, %v2576_v36 }
 0x2a0   :  { %2307 = vmatprep.subr.mxu1 %v2576_v36 }
 0x2a2   :  { %2300 = vmatmul.mubr.msk.f32.vlgmr.msra.gmra.mrb[4].mxu1 %vm206_vm2, %v2716_v39 }
 0x2a3   :  { %2309 = vmatprep.mubr.msk.f32.mxu1 %vm2577_vm1, %v2576_v36 }
 0x371   :  { %v277_v44 = vpop.f32.mrb[2].mxu1 }
 0x372   :  { %v2296_v45 = vpop.f32.mrb[3].mxu1  ;;  %v358_v49 = vsel %vm206_vm2, %v277_v44, -inf }
 0x375   :  { %v354_v46 = vpop.f32.mrb[4].mxu1 }
 0x376   :  { %v2301_v47 = vpop.f32.mrb[5].mxu1  ;;  %v361_v48 = vsel %vm206_vm2, %v354_v46, -inf }
 0x377   :  { %362 = vmax.xlane.f32.xlu1 %v361_v48 }
 0x388   :  { %612 = vrot.lane.b32.xlu1 %v2716_v39, %s2579_s4 }
 0x38c   :  { %610 = vrot.lane.b32.xlu1 %v2716_v39, %s2580_s16 }
 0x3b0   :  { %359 = vmax.xlane.f32.xlu1 %v358_v49 }
 0x3c1   :  { %534 = vrot.lane.b32.xlu1 %v2718_v41, %s2579_s4 }
 0x3c5   :  { %532 = vrot.lane.b32.xlu1 %v2718_v41, %s2580_s16 }
 0x3c9   :  { %1026 = vrot.lane.b32.xlu1 %v2718_v41, %s2581_s17 }
 0x404   :  { %v363_v50 = vpop.xlane.xlu1 %362 }
 0x405   :  { %v365_v51 = vsub.f32 %v354_v46, %v363_v50 }
 0x407   :  { %v368_v52 = vmul.f32 1.442695, %v365_v51 }
 0x408   :  { %v613_v55 = vpop.permute.xlu1 %612 }
 0x409   :  { %2481 = vpow2.f32 %v368_v52 }
 0x40c   :  { %v611_v56 = vpop.permute.xlu1 %610 }
 0x413   :  { %v2482_v53 = vpop.eup %2481 }
 0x414   :  { %v373_v54 = vsel %vm206_vm2, %v2482_v53, 0.0 }
 0x415   :  { %374 = vadd.xlane.f32.xlu0 %v373_v54  ;;  %v200_v54 = vld [vmem:[%s2951_s5 + $0x8] sm:$0xff] }
 0x42b   :  { %456 = vrot.lane.b32.xlu0 %v2716_v39, %s2582_s20 }
 0x43d   :  { %v360_v57 = vpop.xlane.xlu1 %359 }
 0x43e   :  { %v364_v58 = vsub.f32 %v277_v44, %v360_v57 }
 0x440   :  { %v366_v59 = vmul.f32 1.442695, %v364_v58 }
 0x441   :  { %v535_v7 = vpop.permute.xlu1 %534 }
 0x442   :  { %2483 = vpow2.f32 %v366_v59 }
 0x445   :  { %v533_v9 = vpop.permute.xlu1 %532 }
 0x449   :  { %v1027_v26 = vpop.permute.xlu1 %1026 }
 0x44c   :  { %v2484_v60 = vpop.eup %2483 }
 0x44d   :  { %v370_v61 = vsel %vm206_vm2, %v2484_v60, 0.0 }
 0x44e   :  { %371 = vadd.xlane.f32.xlu0 %v370_v61 }
 0x464   :  { %380 = vrot.lane.b32.xlu0 %v2718_v41, %s2582_s20  ;;  %s2589_s20 = smov [#allocation5]  }
 0x4a2   :  { %v375_v62 = vpop.xlane.xlu0 %374 }
 0x4a3   :  { %2485 = vrcp.f32 %v375_v62 }
 0x4a6   :  { %v457_v63 = vpop.permute.xlu0 %456 }
 0x4a7   :  { %2308 = vmatpush3.msra.mxu1 %v457_v63 }
 0x4a8   :  { %2317 = vmatprep.subr.mxu1 %v2576_v36 }
 0x4ad   :  { %v2486_v2 = vpop.eup %2485 }
 0x4ae   :  { %v379_v3 = vmul.f32 %v2486_v2, %v2482_v53 }
 0x4b0   :  { %2310 = vmatmul.mubr.msk.f32.vlgmr.msra.gmra.mrb[6].mxu1 %vm206_vm2, %v379_v3 }
 0x4b1   :  { %2318 = vmatpush3.xpose.msk.msra.mxu1 %vm206_vm2, %v613_v55  ;;  %2319 = vmatprep.mubr.msk.f32.mxu1 %vm2577_vm1, %v2576_v36  ;;  %v199_v55 = vld [vmem:[%s2951_s5] sm:$0xff] }
 0x4b2   :  { %2327 = vmatprep.subr.mxu1 %v2576_v36 }
 0x4b4   :  { %2320 = vmatmul.mubr.msk.f32.vlgmr.msra.gmra.mrb[8].mxu1 %vm206_vm2, %v611_v56 }
 0x4b5   :  { %2329 = vmatprep.mubr.msk.f32.mxu1 %vm2577_vm1, %v2576_v36 }
 0x4db   :  { %v372_v4 = vpop.xlane.xlu0 %371 }
 0x4dc   :  { %2487 = vrcp.f32 %v372_v4 }
 0x4df   :  { %v381_v5 = vpop.permute.xlu0 %380 }
 0x4e0   :  { %2303 = vmatpush3.msra.mxu0 %v381_v5 }
 0x4e1   :  { %2312 = vmatprep.subr.mxu0 %v2576_v36 }
 0x4e6   :  { %v2488_v6 = vpop.eup %2487 }
 0x4e7   :  { %v378_v8 = vmul.f32 %v2488_v6, %v2484_v60 }
 0x4e9   :  { %2305 = vmatmul.mubr.msk.f32.vlgmr.msra.gmra.mrb[0].mxu0 %vm206_vm2, %v378_v8  ;;  %v201_v8 = vld [vmem:[%s2951_s5 + $0x10] sm:$0xff] }
 0x4ea   :  { %2313 = vmatpush3.xpose.msk.msra.mxu0 %vm206_vm2, %v535_v7  ;;  %2314 = vmatprep.mubr.msk.f32.mxu0 %vm2577_vm1, %v2576_v36 }
 0x4eb   :  { %2322 = vmatprep.subr.mxu0 %v2576_v36 }
 0x4ed   :  { %2315 = vmatmul.mubr.msk.f32.vlgmr.msra.gmra.mrb[2].mxu0 %vm206_vm2, %v533_v9 }
 0x4ee   :  { %2324 = vmatprep.mubr.msk.f32.mxu0 %vm2577_vm1, %v2576_v36 }
 0x583   :  { %v2764_v10 = vpop.f32.mrb[6].mxu1 }
 0x584   :  { %v2311_v11 = vpop.f32.mrb[7].mxu1 }
 0x587   :  { %v684_v12 = vpop.f32.mrb[8].mxu1 }
 0x588   :  { %v2321_v13 = vpop.f32.mrb[9].mxu1  ;;  %v691_v14 = vsel %vm206_vm2, %v684_v12, -inf }
 0x589   :  { %692 = vmax.xlane.f32.xlu0 %v691_v14 }
 0x59f   :  { %786 = vrot.lane.b32.xlu0 %v2716_v39, %s2583_s21 }
 0x5a3   :  { %1024 = vrot.lane.b32.xlu0 %v2718_v41, %s2584_s0 }
 0x5a7   :  { %1102 = vrot.lane.b32.xlu0 %v2716_v39, %s2584_s0 }
 0x5bc   :  { %v2771_v15 = vpop.f32.mrb[0].mxu0 }
 0x5bd   :  { %v2306_v16 = vpop.f32.mrb[1].mxu0 }
 0x5c0   :  { %v606_v17 = vpop.f32.mrb[2].mxu0 }
 0x5c1   :  { %v2316_v18 = vpop.f32.mrb[3].mxu0  ;;  %v688_v25 = vsel %vm206_vm2, %v606_v17, -inf }
 0x616   :  { %v693_v19 = vpop.xlane.xlu0 %692 }
 0x617   :  { %v695_v20 = vsub.f32 %v684_v12, %v693_v19 }
 0x619   :  { %v698_v21 = vmul.f32 1.442695, %v695_v20 }
 0x61a   :  { %v787_v22 = vpop.permute.xlu0 %786 }
 0x61b   :  { %2489 = vpow2.f32 %v698_v21  ;;  %2328 = vmatpush3.msra.mxu1 %v787_v22 }
 0x61c   :  { %2342 = vmatprep.subr.mxu1 %v2576_v36 }
 0x61e   :  { %v1025_v30 = vpop.permute.xlu0 %1024 }
 0x622   :  { %v1103_v32 = vpop.permute.xlu0 %1102 }
 0x625   :  { %v2490_v23 = vpop.eup %2489 }
 0x626   :  { %v703_v24 = vsel %vm206_vm2, %v2490_v23, 0.0 }
 0x627   :  { %704 = vadd.xlane.f32.xlu1 %v703_v24 }
 0x638   :  { %1104 = vrot.lane.b32.xlu1 %v2716_v39, %s2581_s17 }
 0x65c   :  { %689 = vmax.xlane.f32.xlu1 %v688_v25 }
 0x6b4   :  { %v705_v27 = vpop.xlane.xlu1 %704 }
 0x6b5   :  { %2491 = vrcp.f32 %v705_v27 }
 0x6b8   :  { %v1105_v31 = vpop.permute.xlu1 %1104 }
 0x6bf   :  { %v2492_v28 = vpop.eup %2491 }
 0x6c0   :  { %v709_v29 = vmul.f32 %v2492_v28, %v2490_v23 }
 0x6c2   :  { %2330 = vmatmul.mubr.msk.f32.vlgmr.msra.gmra.mrb[10].mxu1 %vm206_vm2, %v709_v29 }
 0x6c3   :  { %2343 = vmatpush3.xpose.msk.msra.mxu1 %vm206_vm2, %v1027_v26  ;;  %2344 = vmatprep.mubr.msk.f32.mxu1 %vm2577_vm1, %v2576_v36 }
 0x6c4   :  { %2347 = vmatprep.subr.mxu1 %v2576_v36 }
 0x6c6   :  { %2345 = vmatmul.mubr.msk.f32.vlgmr.msra.gmra.mrb[12].mxu1 %vm206_vm2, %v1025_v30 }
 0x6c7   :  { %2348 = vmatpush3.xpose.msk.msra.mxu1 %vm206_vm2, %v1105_v31  ;;  %2349 = vmatprep.mubr.msk.f32.mxu1 %vm2577_vm1, %v2576_v36 }
 0x6c8   :  { %2357 = vmatprep.subr.mxu1 %v2576_v36 }
 0x6ca   :  { %2350 = vmatmul.mubr.msk.f32.vlgmr.msra.gmra.mrb[14].mxu1 %vm206_vm2, %v1103_v32 }
 0x6cb   :  { %2359 = vmatprep.mubr.msk.f32.mxu1 %vm2577_vm1, %v2576_v36 }
 0x6e9   :  { %v690_v33 = vpop.xlane.xlu1 %689 }
 0x6ea   :  { %v694_v34 = vsub.f32 %v606_v17, %v690_v33 }
 0x6ec   :  { %v696_v35 = vmul.f32 1.442695, %v694_v34 }
 0x6ee   :  { %2493 = vpow2.f32 %v696_v35 }
 0x6f8   :  { %v2494_v37 = vpop.eup %2493 }
 0x6f9   :  { %v700_v38 = vsel %vm206_vm2, %v2494_v37, 0.0 }
 0x6fa   :  { %701 = vadd.xlane.f32.xlu0 %v700_v38 }
 0x710   :  { %710 = vrot.lane.b32.xlu0 %v2718_v41, %s2583_s21  ;;  %s2157_s21 = sshll.u32 %s2589_s20, 4  ;;  %s2158_s21 = int_to_ptr.vmem [resolvable:$true] %s2157_s21 }
 0x711   :  { %s2547_s0 = scalar_lea.vmem %s2158_s21, 256  ;;  %p2552_p9 = scmp.lt.s32.totalorder %s2158_s21, %s2158_s21 }
 0x712   :  { %p2548_p8 = scmp.ne.s32.totalorder %s2158_s21, %s2547_s0  ;;  %p2553_p10 = scmp.lt.s32.totalorder %s2547_s0, %s2547_s0 }
 0x714   :  { %1278 = vrot.lane.b32.xlu0 %v2716_v39, %s2585_s22  ;;  %p2554_p11 = por %p2553_p10, %p2552_p9 }
 0x716   :  { %p2555_p12 = pnand %p2554_p11, %p2548_p8 }
 0x718   :  { %1439 = vrot.lane.b32.xlu0 %v2718_v41, %s2586_s23 }
 0x71c   :  { %1517 = vrot.lane.b32.xlu0 %v2716_v39, %s2586_s23 }
 0x720   :  { %1437 = vrot.lane.b32.xlu0 %v2718_v41, %s2587_s24 }
 0x787   :  { %v702_v40 = vpop.xlane.xlu0 %701 }
 0x788   :  { %2495 = vrcp.f32 %v702_v40 }
 0x78b   :  { %v711_v42 = vpop.permute.xlu0 %710 }
 0x78c   :  { %2323 = vmatpush3.msra.mxu0 %v711_v42 }
 0x78d   :  { %2332 = vmatprep.subr.mxu0 %v200_v54 }
 0x78f   :  { %v1279_v43 = vpop.permute.xlu0 %1278 }
 0x790   :  { %2358 = vmatpush3.msra.mxu1 %v1279_v43 }
 0x791   :  { %2367 = vmatprep.subr.mxu1 %v2576_v36 }
 0x792   :  { %v2496_v44 = vpop.eup %2495 }
 0x793   :  { %v708_v45 = vmul.f32 %v2496_v44, %v2494_v37  ;;  %v1440_v11 = vpop.permute.xlu0 %1439 }
 0x795   :  { %2325 = vmatmul.mubr.msk.f32.vlgmr.msra.gmra.mrb[4].mxu0 %vm206_vm2, %v708_v45  ;;  %v858_v46 = vpop.f32.mrb[10].mxu1 }
 0x796   :  { %v2331_v47 = vpop.f32.mrb[11].mxu1  ;;  %2333 = vmatpush3.msra.mxu0 %v200_v54 }
 0x797   :  { %2337 = vmatprep.subr.mxu0 %v199_v55  ;;  %v1518_v14 = vpop.permute.xlu0 %1517  ;;  %v202_v47 = vld [vmem:[%s2951_s5 + $0x18] sm:$0xff] }
 0x799   :  { %v1098_v48 = vpop.f32.mrb[12].mxu1 }
 0x79a   :  { %v2346_v49 = vpop.f32.mrb[13].mxu1  ;;  %v1180_v50 = vsel %vm206_vm2, %v1098_v48, -inf }
 0x79b   :  { %1181 = vmax.xlane.f32.xlu1 %v1180_v50  ;;  %v1438_v16 = vpop.permute.xlu0 %1437 }
 0x79d   :  { %v1176_v51 = vpop.f32.mrb[14].mxu1 }
 0x79e   :  { %v2351_v52 = vpop.f32.mrb[15].mxu1  ;;  %v1183_v53 = vsel %vm206_vm2, %v1176_v51, -inf }
 0x79f   :  { %1184 = vmax.xlane.f32.xlu1 %v1183_v53 }
 0x828   :  { %v1182_v56 = vpop.xlane.xlu1 %1181 }
 0x829   :  { %v1186_v57 = vsub.f32 %v1098_v48, %v1182_v56 }
 0x82b   :  { %v1188_v58 = vmul.f32 1.442695, %v1186_v57 }
 0x82c   :  { %v1185_v59 = vpop.xlane.xlu1 %1184 }
 0x82d   :  { %2497 = vpow2.f32 %v1188_v58  ;;  %v1187_v60 = vsub.f32 %v1176_v51, %v1185_v59  ;;  %v2206_v51 = vld [vmem:[%s2952_s6] ss:$0 sm:$0xff] }
 0x82f   :  { %v1190_v61 = vmul.f32 1.442695, %v1187_v60 }
 0x831   :  { %2499 = vpow2.f32 %v1190_v61 }
 0x837   :  { %v2498_v62 = vpop.eup %2497 }
 0x838   :  { %v1192_v63 = vsel %vm206_vm2, %v2498_v62, 0.0 }
 0x839   :  { %1193 = vadd.xlane.f32.xlu1 %v1192_v63 }
 0x83b   :  { %v2500_v2 = vpop.eup %2499 }
 0x83c   :  { %v1195_v3 = vsel %vm206_vm2, %v2500_v2, 0.0 }
 0x83d   :  { %1196 = vadd.xlane.f32.xlu1 %v1195_v3 }
 0x84e   :  { %1202 = vrot.lane.b32.xlu1 %v2718_v41, %s2585_s22 }
 0x852   :  { %1515 = vrot.lane.b32.xlu1 %v2716_v39, %s2587_s24 }
 0x868   :  { %v782_v4 = vpop.f32.mrb[4].mxu0 }
 0x869   :  { %v2326_v5 = vpop.f32.mrb[5].mxu0  ;;  %2334 = vmatprep.mubr.msk.f32.mxu0 %vm206_vm2, %v782_v4 }
 0x86a   :  { %2335 = vmatmul.mubr.msk.f32.vlgmr.msra.gmra.mrb[6].mxu0 %vm206_vm2, %v858_v46 }
 0x86b   :  { %2339 = vmatprep.mubr.msk.f32.mxu0 %vm206_vm2, %v2771_v15  ;;  %2338 = vmatpush3.msra.mxu0 %v199_v55 }
 0x86c   :  { %2352 = vmatprep.subr.mxu0 %v2576_v36 }
 0x872   :  { %2340 = vmatmul.mubr.msk.f32.vlgmr.msra.gmra.mrb[6].mxu0 %vm206_vm2, %v2764_v10 }
 0x873   :  { %2354 = vmatprep.mubr.msk.f32.mxu0 %vm2577_vm1, %v2576_v36 }
 0x8c6   :  { %v1194_v6 = vpop.xlane.xlu1 %1193 }
 0x8c7   :  { %2501 = vrcp.f32 %v1194_v6  ;;  %v1905_v6 = vld [vmem:[%s2955_s9] sm:$0xff] }
 0x8ca   :  { %v1197_v7 = vpop.xlane.xlu1 %1196 }
 0x8cb   :  { %2503 = vrcp.f32 %v1197_v7  ;;  %v1906_v7 = vld [vmem:[%s2955_s9 + $0x8] sm:$0xff] }
 0x8ce   :  { %v1203_v9 = vpop.permute.xlu1 %1202 }
 0x8cf   :  { %2353 = vmatpush3.msra.mxu0 %v1203_v9  ;;  %v1907_v9 = vld [vmem:[%s2955_s9 + $0x10] sm:$0xff] }
 0x8d0   :  { %2362 = vmatprep.subr.mxu0 %v201_v8 }
 0x8d1   :  { %v2502_v12 = vpop.eup %2501 }
 0x8d2   :  { %v1200_v13 = vmul.f32 %v2502_v12, %v2498_v62  ;;  %v1516_v21 = vpop.permute.xlu1 %1515 }
 0x8d4   :  { %2355 = vmatmul.mubr.msk.f32.vlgmr.msra.gmra.mrb[8].mxu0 %vm206_vm2, %v1200_v13 }
 0x8d5   :  { %v2504_v10 = vpop.eup %2503  ;;  %2363 = vmatpush3.msra.mxu0 %v201_v8  ;;  %v2430_v8 = vpack.c.bf16 %v1906_v7, %v1905_v6 }
 0x8d6   :  { %v1201_v15 = vmul.f32 %v2504_v10, %v2500_v2  ;;  %2372 = vmatprep.subr.mxu0 %v2576_v36 }
 0x8d8   :  { %2360 = vmatmul.mubr.msk.f32.vlgmr.msra.gmra.mrb[16].mxu1 %vm206_vm2, %v1201_v15 }
 0x8d9   :  { %2368 = vmatpush3.xpose.msk.msra.mxu1 %vm206_vm2, %v1440_v11  ;;  %2369 = vmatprep.mubr.msk.f32.mxu1 %vm2577_vm1, %v2576_v36  ;;  %v1908_v11 = vld [vmem:[%s2955_s9 + $0x18] sm:$0xff] }
 0x8da   :  { %2377 = vmatprep.subr.mxu1 %v2576_v36  ;;  %v2434_v12 = vpack.c.bf16 %v1908_v11, %v1907_v9 }
 0x8dc   :  { %2370 = vmatmul.mubr.msk.f32.vlgmr.msra.gmra.mrb[18].mxu1 %vm206_vm2, %v1438_v16 }
 0x8dd   :  { %2379 = vmatprep.mubr.msk.f32.mxu1 %vm2577_vm1, %v2576_v36 }
 0x9a7   :  { %v1274_v17 = vpop.f32.mrb[8].mxu0 }
 0x9a8   :  { %v2356_v18 = vpop.f32.mrb[9].mxu0  ;;  %2364 = vmatprep.mubr.msk.f32.mxu0 %vm206_vm2, %v1274_v17 }
 0x9ab   :  { %v1350_v19 = vpop.f32.mrb[16].mxu1 }
 0x9ac   :  { %v2361_v20 = vpop.f32.mrb[17].mxu1  ;;  %2365 = vmatmul.mubr.msk.f32.vlgmr.msra.gmra.mrb[6].mxu0 %vm206_vm2, %v1350_v19  ;;  %v2207_v19 = vld [vmem:[%s2953_s7] ss:$0 sm:$0xff] }
 0x9ad   :  { %2373 = vmatpush3.xpose.msk.msra.mxu0 %vm206_vm2, %v1518_v14  ;;  %2374 = vmatprep.mubr.msk.f32.mxu0 %vm2577_vm1, %v2576_v36 }
 0x9ae   :  { %2382 = vmatprep.subr.mxu0 %v2576_v36 }
 0x9af   :  { %v1511_v22 = vpop.f32.mrb[18].mxu1 }
 0x9b0   :  { %v2371_v23 = vpop.f32.mrb[19].mxu1  ;;  %2375 = vmatmul.mubr.msk.f32.vlgmr.msra.gmra.mrb[10].mxu0 %vm206_vm2, %v1516_v21  ;;  %v1593_v24 = vsel %vm206_vm2, %v1511_v22, -inf }
 0x9b1   :  { %1594 = vmax.xlane.f32.xlu0 %v1593_v24  ;;  %2384 = vmatprep.mubr.msk.f32.mxu0 %vm2577_vm1, %v2576_v36  ;;  %v2208_v23 = vld [vmem:[%s2954_s8] ss:$0 sm:$0xff] }
 0xa3e   :  { %v1595_v25 = vpop.xlane.xlu0 %1594 }
 0xa3f   :  { %v1599_v26 = vsub.f32 %v1511_v22, %v1595_v25 }
 0xa41   :  { %v1601_v27 = vmul.f32 1.442695, %v1599_v26 }
 0xa43   :  { %2505 = vpow2.f32 %v1601_v27 }
 0xa4d   :  { %v2506_v28 = vpop.eup %2505 }
 0xa4e   :  { %v1605_v29 = vsel %vm206_vm2, %v2506_v28, 0.0 }
 0xa4f   :  { %1606 = vadd.xlane.f32.xlu0 %v1605_v29  ;;  %v2052_v29 = vld [vmem:[%s2957_s11 + $0x8] sm:$0xff] }
 0xa83   :  { %v1589_v30 = vpop.f32.mrb[10].mxu0 }
 0xa84   :  { %v2376_v31 = vpop.f32.mrb[11].mxu0  ;;  %v1596_v32 = vsel %vm206_vm2, %v1589_v30, -inf }
 0xa85   :  { %1597 = vmax.xlane.f32.xlu1 %v1596_v32  ;;  %v2053_v31 = vld [vmem:[%s2957_s11 + $0x10] sm:$0xff]  ;;  %v2054_v32 = vld [vmem:[%s2957_s11 + $0x18] sm:$0xff] }
 0xa96   :  { %1691 = vrot.lane.b32.xlu1 %v2716_v39, %s2588_s3 }
 0xadc   :  { %v1607_v40 = vpop.xlane.xlu0 %1606 }
 0xb12   :  { %v1598_v33 = vpop.xlane.xlu1 %1597 }
 0xb13   :  { %v1600_v34 = vsub.f32 %v1589_v30, %v1598_v33  ;;  %v2442_v33 = vpack.c.bf16 %v2054_v32, %v2053_v31 }
 0xb15   :  { %v1603_v35 = vmul.f32 1.442695, %v1600_v34  ;;  %v2055_v34 = vld [vmem:[%s2957_s11 + $0x20] sm:$0xff] }
 0xb16   :  { %v1692_v36 = vpop.permute.xlu1 %1691 }
 0xb17   :  { %2507 = vpow2.f32 %v1603_v35  ;;  %2383 = vmatpush3.msra.mxu0 %v1692_v36  ;;  %v2056_v35 = vld [vmem:[%s2957_s11 + $0x28] sm:$0xff] }
 0xb18   :  { %2509 = vrcp.f32 %v1607_v40  ;;  %2387 = vmatprep.subr.mxu0 %v202_v47  ;;  %v2446_v36 = vpack.c.bf16 %v2056_v35, %v2055_v34 }
 0xb21   :  { %v2508_v37 = vpop.eup %2507 }
 0xb22   :  { %v1608_v38 = vsel %vm206_vm2, %v2508_v37, 0.0  ;;  %v2510_v43 = vpop.eup %2509 }
 0xb23   :  { %1609 = vadd.xlane.f32.xlu0 %v1608_v38  ;;  %v1613_v44 = vmul.f32 %v2510_v43, %v2506_v28  ;;  %v2051_v28 = vld [vmem:[%s2957_s11] sm:$0xff]  ;;  %v2058_v38 = vld [vmem:[%s2957_s11 + $0x38] sm:$0xff] }
 0xb24   :  { %v2438_v30 = vpack.c.bf16 %v2052_v29, %v2051_v28 }
 0xb39   :  { %1615 = vrot.lane.b32.xlu0 %v2718_v41, %s2588_s3 }
 0xbb0   :  { %v1610_v42 = vpop.xlane.xlu0 %1609 }
 0xbb1   :  { %2511 = vrcp.f32 %v1610_v42  ;;  %v2209_v42 = vld [vmem:[%s2956_s10] ss:$0 sm:$0xff] }
 0xbb4   :  { %v1616_v45 = vpop.permute.xlu0 %1615 }
 0xbb5   :  { %2378 = vmatpush3.msra.mxu1 %v1616_v45 }
 0xbb6   :  { %2380 = vmatmul.mubr.msk.f32.vlgmr.msra.gmra.mrb[20].mxu1 %vm206_vm2, %v1613_v44  ;;  %2431 = vmatprep.subr.bf16.mxu1 %v2430_v8 }
 0xbb7   :  { %2433 = vmatpush3.bf16.msra.mxu1 %v2430_v8 }
 0xbb8   :  { %2435 = vmatprep.subr.bf16.mxu1 %v2434_v12 }
 0xbbb   :  { %v2512_v39 = vpop.eup %2511  ;;  %2437 = vmatpush3.bf16.msra.mxu1 %v2434_v12 }
 0xbbc   :  { %v1614_v46 = vmul.f32 %v2512_v39, %v2508_v37  ;;  %v2057_v37 = vld [vmem:[%s2957_s11 + $0x30] sm:$0xff] }
 0xbbd   :  { %v2450_v40 = vpack.c.bf16 %v2058_v38, %v2057_v37 }
 0xbbe   :  { %2385 = vmatmul.mubr.msk.f32.vlgmr.msra.gmra.mrb[12].mxu0 %vm206_vm2, %v1614_v46 }
 0xbbf   :  { %2388 = vmatpush3.msra.mxu0 %v202_v47 }
 0xbc0   :  { %2439 = vmatprep.subr.bf16.mxu0 %v2438_v30 }
 0xc89   :  { %v1687_v41 = vpop.f32.mrb[20].mxu1 }
 0xc8a   :  { %v2381_v48 = vpop.f32.mrb[21].mxu1  ;;  %2389 = vmatprep.mubr.msk.f32.mxu0 %vm206_vm2, %v1687_v41 }
 0xc91   :  { %v1763_v49 = vpop.f32.mrb[12].mxu0 }
 0xc92   :  { %v2386_v50 = vpop.f32.mrb[13].mxu0  ;;  %2390 = vmatmul.mubr.msk.f32.vlgmr.msra.gmra.mrb[6].mxu0 %vm206_vm2, %v1763_v49 }
 0xc93   :  { %2441 = vmatpush3.bf16.msra.mxu0 %v2438_v30 }
 0xc94   :  { %2443 = vmatprep.subr.bf16.mxu0 %v2442_v33 }
 0xc97   :  { %2445 = vmatpush3.bf16.msra.mxu0 %v2442_v33  ;;  %v2212_v33 = vld [vmem:[%s2958_s12] ss:$0 sm:$0xff] }
 0xc98   :  { %2447 = vmatprep.subr.bf16.mxu0 %v2446_v36 }
 0xc9b   :  { %2449 = vmatpush3.bf16.msra.mxu0 %v2446_v36 }
 0xc9c   :  { %2451 = vmatprep.subr.bf16.mxu0 %v2450_v40 }
 0xc9f   :  { %2453 = vmatpush3.bf16.msra.mxu0 %v2450_v40 }
 0xd65   :  { %v2391_v52 = vpop.f32.mrb[6].mxu0 }
 0xd66   :  { %v1858_v53 = vadd.f32 %v2391_v52, %v2206_v51  ;;  %v1839_v54 = vpop.f32.mrb[7].mxu0 }
 0xd67   :  { %v1857_v55 = vadd.f32 %v2206_v51, %v1839_v54 }
 0xd68   :  { %v2864_v56 = vadd.f32 %v1858_v53, %v2677_v1 }
 0xd69   :  { %v2867_v57 = vadd.f32 %v1857_v55, %v2675_v0 }
 0xd6a   :  { %v1866_v58 = vsel %vm63_vm0, %v2864_v56, 0.0 }
 0xd6b   :  { %1867 = vadd.xlane.f32.xlu0 %v1866_v58  ;;  %v1863_v59 = vsel %vm63_vm0, %v2867_v57, 0.0 }
 0xd6c   :  { %1864 = vadd.xlane.f32.xlu1 %v1863_v59 }
 0xdf8   :  { %v1868_v60 = vpop.xlane.xlu0 %1867 }
 0xdf9   :  { %v1870_v61 = vmul.f32 0.03125, %v1868_v60  ;;  %v1865_v62 = vpop.xlane.xlu1 %1864 }
 0xdfa   :  { %v1869_v63 = vmul.f32 0.03125, %v1865_v62 }
 0xdfb   :  { %v1872_v2 = vsub.f32 %v2864_v56, %v1870_v61 }
 0xdfc   :  { %v1871_v1 = vsub.f32 %v2867_v57, %v1869_v63 }
 0xdfd   :  { %v1874_v3 = vmul.f32 %v1872_v2, %v1872_v2 }
 0xdfe   :  { %v1873_v4 = vmul.f32 %v1871_v1, %v1871_v1 }
 0xdff   :  { %v1878_v0 = vsel %vm63_vm0, %v1874_v3, 0.0 }
 0xe00   :  { %1879 = vadd.xlane.f32.xlu1 %v1878_v0  ;;  %v1875_v5 = vsel %vm63_vm0, %v1873_v4, 0.0 }
 0xe01   :  { %1876 = vadd.xlane.f32.xlu0 %v1875_v5 }
 0xe8d   :  { %v1880_v13 = vpop.xlane.xlu1 %1879 }
 0xe8e   :  { %v1882_v10 = vmul.f32 0.03125, %v1880_v13  ;;  %v1877_v14 = vpop.xlane.xlu0 %1876 }
 0xe8f   :  { %v1881_v15 = vmul.f32 0.03125, %v1877_v14 }
 0xe90   :  { %v1884_v16 = vadd.f32 1e-06, %v1882_v10 }
 0xe91   :  { %v1883_v17 = vadd.f32 1e-06, %v1881_v15 }
 0xe92   :  { %2513 = vrsqrt.f32 %v1884_v16 }
 0xe93   :  { %2515 = vrsqrt.f32 %v1883_v17 }
 0xe9c   :  { %v2514_v18 = vpop.eup %2513 }
 0xe9d   :  { %v2516_v20 = vpop.eup %2515  ;;  %v1888_v21 = vmul.f32 %v2514_v18, %v1872_v2 }
 0xe9e   :  { %v1887_v22 = vmul.f32 %v2516_v20, %v1871_v1 }
 0xe9f   :  { %v1896_v24 = vmul.f32 %v2207_v19, %v1888_v21 }
 0xea0   :  { %v1895_v25 = vmul.f32 %v2207_v19, %v1887_v22 }
 0xea1   :  { %v1904_v27 = vadd.f32 %v2208_v23, %v1896_v24 }
 0xea2   :  { %v1903_v26 = vadd.f32 %v2208_v23, %v1895_v25 }
 0xea4   :  { %2400 = vmatprep.mubr.msk.f32.mxu1 %vm63_vm0, %v1903_v26 }
 0xea5   :  { %2401 = vmatmul.mubr.msk.f32.vlgmr.msra.gmra.mrb[22].mxu1 %vm63_vm0, %v1904_v27 }
 0xf78   :  { %v2402_v43 = vpop.f32.mrb[22].mxu1 }
 0xf79   :  { %v1994_v44 = vadd.f32 %v2402_v43, %v2209_v42  ;;  %v1988_v45 = vpop.f32.mrb[23].mxu1 }
 0xf7a   :  { %v1989_v39 = vadd.f32 %v2209_v42, %v1988_v45 }
 0xf7b   :  { %v2000_v46 = vmul.f32 0.70710677, %v1994_v44  ;;  %v1998_v30 = vmul.f32 0.5, %v1994_v44 }
 0xf7c   :  { %v1999_v47 = vmul.f32 0.70710677, %v1989_v39  ;;  %v1997_v28 = vmul.f32 0.5, %v1989_v39 }
 0xf7d   :  { %v2002_v41 = vand.u32 2147483647, %v2000_v46  ;;  %vm2042_vm3 = vcmp.lt.f32.partialorder %v2000_v46, 0.0 }
 0xf7e   :  { %v2001_v48 = vand.u32 2147483647, %v1999_v47  ;;  %vm2041_vm4 = vcmp.lt.f32.partialorder %v1999_v47, 0.0 }
 0xf7f   :  { %v2004_v49 = vmul.f32 0.3275911, %v2002_v41  ;;  %v2030_v53 = vsub.f32 0.0, %v2002_v41 }
 0xf80   :  { %v2003_v50 = vmul.f32 0.3275911, %v2001_v48  ;;  %v2029_v54 = vsub.f32 0.0, %v2001_v48 }
 0xf81   :  { %v2006_v51 = vadd.f32 1.0, %v2004_v49  ;;  %v2032_v58 = vmul.f32 %v2030_v53, %v2002_v41 }
 0xf82   :  { %v2005_v52 = vadd.f32 1.0, %v2003_v50  ;;  %v2031_v61 = vmul.f32 %v2029_v54, %v2001_v48 }
 0xf83   :  { %2517 = vrcp.f32 %v2006_v51  ;;  %v2035_v2 = vmul.f32 1.442695, %v2032_v58 }
 0xf84   :  { %2519 = vrcp.f32 %v2005_v52  ;;  %v2033_v4 = vmul.f32 1.442695, %v2031_v61 }
 0xf85   :  { %2521 = vpow2.f32 %v2035_v2 }
 0xf86   :  { %2523 = vpow2.f32 %v2033_v4 }
 0xf8d   :  { %v2518_v55 = vpop.eup %2517 }
 0xf8e   :  { %v2520_v59 = vpop.eup %2519  ;;  %v2012_v60 = vmul.f32 1.0614054, %v2518_v55 }
 0xf8f   :  { %v2011_v62 = vmul.f32 1.0614054, %v2520_v59  ;;  %v2522_v16 = vpop.eup %2521 }
 0xf90   :  { %v2014_v63 = vadd.f32 -1.4531521, %v2012_v60  ;;  %v2524_v18 = vpop.eup %2523 }
 0xf91   :  { %v2013_v1 = vadd.f32 -1.4531521, %v2011_v62 }
 0xf92   :  { %v2016_v3 = vmul.f32 %v2518_v55, %v2014_v63 }
 0xf93   :  { %v2015_v0 = vmul.f32 %v2520_v59, %v2013_v1 }
 0xf94   :  { %v2018_v5 = vadd.f32 1.4214138, %v2016_v3 }
 0xf95   :  { %v2017_v6 = vadd.f32 1.4214138, %v2015_v0 }
 0xf96   :  { %v2020_v7 = vmul.f32 %v2518_v55, %v2018_v5 }
 0xf97   :  { %v2019_v8 = vmul.f32 %v2520_v59, %v2017_v6 }
 0xf98   :  { %v2022_v9 = vadd.f32 -0.28449672, %v2020_v7 }
 0xf99   :  { %v2021_v11 = vadd.f32 -0.28449672, %v2019_v8 }
 0xf9a   :  { %v2024_v12 = vmul.f32 %v2518_v55, %v2022_v9 }
 0xf9b   :  { %v2023_v13 = vmul.f32 %v2520_v59, %v2021_v11 }
 0xf9c   :  { %v2026_v10 = vadd.f32 0.2548296, %v2024_v12 }
 0xf9d   :  { %v2025_v14 = vadd.f32 0.2548296, %v2023_v13 }
 0xf9e   :  { %v2028_v15 = vmul.f32 %v2518_v55, %v2026_v10 }
 0xf9f   :  { %v2027_v17 = vmul.f32 %v2520_v59, %v2025_v14 }
 0xfa0   :  { %v2038_v19 = vmul.f32 %v2522_v16, %v2028_v15 }
 0xfa1   :  { %v2037_v20 = vmul.f32 %v2524_v18, %v2027_v17 }
 0xfa2   :  { %v2040_v21 = vsub.f32 1.0, %v2038_v19 }
 0xfa3   :  { %v2039_v22 = vsub.f32 1.0, %v2037_v20 }
 0xfa4   :  { %v2044_v23 = vsub.f32 0.0, %v2040_v21 }
 0xfa5   :  { %v2043_v24 = vsub.f32 0.0, %v2039_v22 }
 0xfa6   :  { %v2046_v25 = vsel %vm2042_vm3, %v2044_v23, %v2040_v21 }
 0xfa7   :  { %v2048_v26 = vadd.f32 1.0, %v2046_v25  ;;  %v2045_v27 = vsel %vm2041_vm4, %v2043_v24, %v2039_v22 }
 0xfa8   :  { %v2047_v29 = vadd.f32 1.0, %v2045_v27 }
 0xfa9   :  { %v2050_v32 = vmul.f32 %v2048_v26, %v1998_v30 }
 0xfaa   :  { %v2049_v31 = vmul.f32 %v2047_v29, %v1997_v28 }
 0xfac   :  { %2419 = vmatprep.mubr.msk.f32.mxu0 %vm2066_vm5, %v2049_v31 }
 0xfad   :  { %2420 = vmatmul.mubr.msk.f32.vlgmr.msra.gmra.mrb[14].mxu0 %vm2066_vm5, %v2050_v32 }
0x1080   :  { %v2421_v34 = vpop.f32.mrb[14].mxu0 }
0x1081   :  { %v2145_v35 = vadd.f32 %v2421_v34, %v2212_v33  ;;  %v2139_v36 = vpop.f32.mrb[15].mxu0 }
0x1082   :  { %v2140_v37 = vadd.f32 %v2212_v33, %v2139_v36 }
0x1083   :  { %v2149_v38 = vadd.f32 %v2145_v35, %v2864_v56 }
0x1084   :  { %v2148_v40 = vadd.f32 %v2140_v37, %v2867_v57 }
0x1085   :  { %2151 = vst.msk [vmem:[#allocation5 + $0x8] sm:$0xff] %vm63_vm0, %v2149_v38 }
0x1086   :  { %2150 = vst.msk [vmem:[#allocation5] sm:$0xff] %vm63_vm0, %v2148_v40 }
0x1087   :  { %2558 = shalt.err (!%p2555_p12)
}
0x1088   :  { %s2559_s23 = scalar_lea.hbm %s2959_s13, 256 }
0x1089   :  { %p2560_p13 = scmp.ne.s32.totalorder %s2959_s13, %s2559_s23  ;;  %p2563_p0 = scmp.lt.u32.totalorder %s2559_s23, %s2959_s13 }
0x108b   :  { %p2565_p1 = pnand %p2563_p0, %p2560_p13 }
0x108d   :  { %2568 = shalt.err (!%p2565_p1)
}
0x108e   :  { %2163 = dma.vmem_to_hbm [thread:$0]  %s2158_s21, 256, %s2959_s13, [#allocation4], %s2574_s18, %s2574_s18, %s2575_s19  }
0x108f   :  { %2571 = dma.done.wait [#allocation4], 256  }
0x1090   :  { %2572 = vsyncadd [#allocation4], 4294967040 }
0x1091   :  { %2167 = vsyncpa [#allocation3], 1 }
0x1092   :  { %2168 = vsyncpa [#allocation4], 1 }

</bundles_post_ra>
